<compile_context>
chip_gen: v5e
topology: v5e:2x2
jax: 0.10.0
libtpu: 0.0.40
codegen_flags: <defaults>
</compile_context>

<pallas_src>
import functools

import jax
import jax.numpy as jnp
from jax.experimental import pallas as pl
from jax.experimental.pallas import tpu as pltpu


def _round_up(x, m):
    return ((x + m - 1) // m) * m


def _largest_divisor_leq(n, cap):
    cap = max(1, min(cap, n))
    for d in range(cap, 0, -1):
        if n % d == 0:
            return d
    return 1


def _reassemble_kernel(x_ref, w_ref, b_ref, o_ref, *, th, w_out, wp):
    """One (batch, H-tile) step.

    x_ref: (1, Hp*Wp, Cin_p)   flattened edge-padded NHWC input (resident per n)
    w_ref: (Cin_p, Cout_p)     1x1 conv weight (compute dtype, e.g. bf16)
    b_ref: (1, Cout_p)         bias (f32)
    o_ref: (1, 4, th, W, Cout_p)  phase planes, index = 2*eh + ew
    """
    t = pl.program_id(1)
    rows = th + 2                                    # own rows + 1-row halo each side
    start = pl.multiple_of(t * th * wp, 8)           # wp % 8 == 0 -> aligned slab
    xs = x_ref[0, pl.ds(start, rows * wp), :]        # (rows*wp, Cin_p)

    # 1x1 conv == channel matmul on the MXU, f32 accumulation.
    y = jnp.dot(xs, w_ref[...], preferred_element_type=jnp.float32)
    y = y + b_ref[...]                               # (rows*wp, Cout_p) f32
    y = y.reshape(rows, wp, y.shape[-1])             # layout-preserving: wp % 8 == 0

    # Separable 2x bilinear (align_corners=False) == 0.25/0.75 two-tap stencil.
    # Padded col q corresponds to source col q-1 (replicate pad handles clamping).
    c_prev = y[:, 0:w_out, :]
    c_cur = y[:, 1:w_out + 1, :]
    c_next = y[:, 2:w_out + 2, :]
    we = 0.25 * c_prev + 0.75 * c_cur                # even output columns (ew = 0)
    wo = 0.75 * c_cur + 0.25 * c_next                # odd  output columns (ew = 1)

    # Rows: local row j+1 is the tile's own row j; rows j / j+2 are its halo.
    dt = o_ref.dtype
    o_ref[0, 0] = (0.25 * we[0:th] + 0.75 * we[1:th + 1]).astype(dt)      # (eh,ew)=(0,0)
    o_ref[0, 1] = (0.25 * wo[0:th] + 0.75 * wo[1:th + 1]).astype(dt)      # (0,1)
    o_ref[0, 2] = (0.75 * we[1:th + 1] + 0.25 * we[2:th + 2]).astype(dt)  # (1,0)
    o_ref[0, 3] = (0.75 * wo[1:th + 1] + 0.25 * wo[2:th + 2]).astype(dt)  # (1,1)


@functools.partial(jax.jit, static_argnames=("tile_h", "compute_dtype"))
def reassemble_project_upsample(x_nchw, weight, bias, *, tile_h=32,
                                compute_dtype=jnp.bfloat16):
    """One ReassembleBlocks level.

    x_nchw: (N, Cin, H, W); weight: (Cout, Cin, 1, 1); bias: (Cout,)
    returns (N, Cout, 2H, 2W) in x_nchw.dtype (PyTorch NCHW convention).
    """
    N, Cin, H, W = x_nchw.shape
    Cout = weight.shape[0]
    out_dtype = x_nchw.dtype

    cin_p = _round_up(Cin, 128)                       # lane-dense K for the MXU
    cout_p = _round_up(Cout, 128)                     # lane-dense N / dense stores
    hp = H + 2                                        # 1-row replicate halo each side
    wp = _round_up(W + 2, 8)                          # halo + sublane alignment
    th = _largest_divisor_leq(H, tile_h)              # H-tile height
    n_ht = H // th

    # NHWC, edge-replicate 1-pixel halo (implements the bilinear boundary clamp),
    # then zero-pad W -> wp and Cin -> cin_p; flatten spatial.
    x = jnp.transpose(x_nchw, (0, 2, 3, 1)).astype(compute_dtype)      # (N, H, W, Cin)
    x = jnp.pad(x, ((0, 0), (1, 1), (1, 1), (0, 0)), mode="edge")      # (N, hp, W+2, Cin)
    x = jnp.pad(x, ((0, 0), (0, 0), (0, wp - (W + 2)), (0, cin_p - Cin)))
    x = x.reshape(N, hp * wp, cin_p)

    w = weight[:, :, 0, 0].T.astype(compute_dtype)                     # (Cin, Cout)
    w = jnp.pad(w, ((0, cin_p - Cin), (0, cout_p - Cout)))
    b = jnp.pad(bias.astype(jnp.float32), (0, cout_p - Cout)).reshape(1, cout_p)

    kernel = functools.partial(_reassemble_kernel, th=th, w_out=W, wp=wp)
    out5 = pl.pallas_call(
        kernel,
        out_shape=jax.ShapeDtypeStruct((N, 4, H, W, cout_p), out_dtype),
        grid_spec=pltpu.PrefetchScalarGridSpec(
            num_scalar_prefetch=0,
            grid=(N, n_ht),
            in_specs=[
                # Full padded image resident per batch element (re-DMA only when n changes).
                pl.BlockSpec((1, hp * wp, cin_p), lambda n, t: (n, 0, 0)),
                pl.BlockSpec((cin_p, cout_p), lambda n, t: (0, 0)),
                pl.BlockSpec((1, cout_p), lambda n, t: (0, 0)),
            ],
            out_specs=pl.BlockSpec((1, 4, th, W, cout_p),
                                   lambda n, t: (n, 0, t, 0, 0)),
        ),
        compiler_params=pltpu.CompilerParams(
            dimension_semantics=("parallel", "parallel")),
    )(x, w, b)

    # (N, 4=2*eh+ew, H, W, Cout_p) -> slice channel pad -> interleave -> NCHW.
    out = out5[..., :Cout].reshape(N, 2, 2, H, W, Cout)
    out = jnp.transpose(out, (0, 5, 3, 1, 4, 2))                       # (N, C, H, eh, W, ew)
    return out.reshape(N, Cout, 2 * H, 2 * W)


class ReassembleBlocks:
    """JAX/Pallas port of the PyTorch ReassembleBlocks module (1x1 conv + 2x bilinear)."""

    def __init__(self, embed_dim, post_process_channels, key,
                 compute_dtype=jnp.bfloat16):
        self.compute_dtype = compute_dtype
        self.params = []
        bound = 1.0 / (embed_dim ** 0.5)              # Conv2d default init bound (1x1)
        for i, cout in enumerate(post_process_channels):
            kw, kb = jax.random.split(jax.random.fold_in(key, i))
            w = jax.random.uniform(kw, (cout, embed_dim, 1, 1),
                                   jnp.float32, -bound, bound)
            b = jax.random.uniform(kb, (cout,), jnp.float32, -bound, bound)
            self.params.append((w, b))

    def __call__(self, inputs, tile_h=32):
        return [reassemble_project_upsample(x, w, b, tile_h=tile_h,
                                            compute_dtype=self.compute_dtype)
                for x, (w, b) in zip(inputs, self.params)]


# ---------------- pure-JAX reference (for correctness check) -----------------
def _reference_level(x_nchw, weight, bias, compute_dtype=jnp.bfloat16):
    # Same numerics as the kernel: bf16-rounded x/w, f32 accumulation & stencil.
    xb = x_nchw.astype(compute_dtype).astype(jnp.float32)
    wb = weight[:, :, 0, 0].astype(compute_dtype).astype(jnp.float32)
    y = jnp.einsum("nchw,oc->nohw", xb, wb, precision=jax.lax.Precision.HIGHEST)
    y = y + bias.astype(jnp.float32)[None, :, None, None]
    N, C, H, W = y.shape

    def axis_idx(in_size):
        dst = jnp.arange(2 * in_size, dtype=jnp.float32)
        src = jnp.maximum((dst + 0.5) * 0.5 - 0.5, 0.0)
        i0 = jnp.clip(jnp.floor(src).astype(jnp.int32), 0, in_size - 1)
        i1 = jnp.minimum(i0 + 1, in_size - 1)
        f = src - i0.astype(jnp.float32)
        return i0, i1, f

    h0, h1, fh = axis_idx(H)
    w0, w1, fw = axis_idx(W)
    yh = (y[:, :, h0, :] * (1.0 - fh)[None, None, :, None]
          + y[:, :, h1, :] * fh[None, None, :, None])
    out = yh[:, :, :, w0] * (1.0 - fw) + yh[:, :, :, w1] * fw
    return out


if __name__ == "__main__":
    key = jax.random.PRNGKey(0)
    embed_dim = 32
    post_process_channels = [8, 16]
    N, H, W = 2, 8, 8

    k_in, k_params = jax.random.split(key)
    ks = jax.random.split(k_in, len(post_process_channels))
    inputs = [jax.random.normal(ks[i], (N, embed_dim, H, W), jnp.float32)
              for i in range(len(post_process_channels))]

    module = ReassembleBlocks(embed_dim, post_process_channels, k_params)
    outputs = module(inputs, tile_h=4)         # 2 H-tiles per image: exercises the grid
    outputs = [jax.block_until_ready(o) for o in outputs]

    for x, (w, b), o, cout in zip(inputs, module.params, outputs,
                                  post_process_channels):
        assert o.shape == (N, cout, 2 * H, 2 * W), o.shape
        ref = _reference_level(x, w, b, module.compute_dtype)
        err = float(jnp.max(jnp.abs(o - ref)))
        assert jnp.allclose(o, ref, atol=2e-3, rtol=2e-3), err

    print("KERNEL_OK")
</pallas_src>

<mosaic_0001>
module attributes {stable_mosaic.version = 11 : i64} {
  func.func @_reassemble_kernel(%arg0: i32, %arg1: i32, %arg2: memref<1x160x128xbf16, #tpu.memory_space<vmem>>, %arg3: memref<128x128xbf16, #tpu.memory_space<vmem>>, %arg4: memref<1x128xf32, #tpu.memory_space<vmem>>, %arg5: memref<1x4x4x8x128xf32, #tpu.memory_space<vmem>>) attributes {dimension_semantics = [#tpu.dimension_semantics<parallel>, #tpu.dimension_semantics<parallel>], iteration_bounds = array<i64: 2, 2>, scalar_prefetch = 0 : i64, scratch_operands = 0 : i64, tpu.core_type = #tpu.core_type<tc>, window_params = [{transform_indices = @transform_0, window_bounds = array<i64: 1, 160, 128>}, {pipeline_mode = #tpu.pipeline_mode<synchronous>, transform_indices = @transform_1, window_bounds = array<i64: 128, 128>}, {pipeline_mode = #tpu.pipeline_mode<synchronous>, transform_indices = @transform_2, window_bounds = array<i64: 1, 128>}, {transform_indices = @transform_3, window_bounds = array<i64: 1, 4, 4, 8, 128>}]} {
    %c4_i32 = arith.constant 4 : i32
    %0 = arith.muli %arg1, %c4_i32 : i32
    %c16_i32 = arith.constant 16 : i32
    %1 = arith.muli %0, %c16_i32 : i32
    %2 = tpu.assume_multiple %1, 8 : i32
    %c0 = arith.constant 0 : index
    %3 = arith.index_cast %2 : i32 to index
    %c0_0 = arith.constant 0 : index
    %4 = vector.load %arg2[%c0, %3, %c0_0] : memref<1x160x128xbf16, #tpu.memory_space<vmem>>, vector<1x96x128xbf16>
    %5 = vector.shape_cast %4 : vector<1x96x128xbf16> to vector<96x128xbf16>
    %c0_1 = arith.constant 0 : index
    %c0_2 = arith.constant 0 : index
    %6 = vector.load %arg3[%c0_1, %c0_2] : memref<128x128xbf16, #tpu.memory_space<vmem>>, vector<128x128xbf16>
    %cst = arith.constant dense<0.000000e+00> : vector<96x128xf32>
    %7 = tpu.matmul %5, %6, %cst {dimension_numbers = #tpu.dot_dimension_numbers<[1], [0], [0], [1], [0, 0, 1, 1], [], []>} : vector<96x128xbf16>, vector<128x128xbf16>, vector<96x128xf32> -> vector<96x128xf32>
    %c0_3 = arith.constant 0 : index
    %c0_4 = arith.constant 0 : index
    %8 = vector.load %arg4[%c0_3, %c0_4] : memref<1x128xf32, #tpu.memory_space<vmem>>, vector<1x128xf32>
    %9 = vector.broadcast %8 : vector<1x128xf32> to vector<96x128xf32>
    %10 = arith.addf %7, %9 : vector<96x128xf32>
    %11 = vector.shape_cast %10 : vector<96x128xf32> to vector<6x16x128xf32>
    %12 = vector.extract_strided_slice %11 {offsets = [0, 0, 0], sizes = [6, 8, 128], strides = [1, 1, 1]} : vector<6x16x128xf32> to vector<6x8x128xf32>
    %13 = vector.extract_strided_slice %11 {offsets = [0, 1, 0], sizes = [6, 8, 128], strides = [1, 1, 1]} : vector<6x16x128xf32> to vector<6x8x128xf32>
    %14 = vector.extract_strided_slice %11 {offsets = [0, 2, 0], sizes = [6, 8, 128], strides = [1, 1, 1]} : vector<6x16x128xf32> to vector<6x8x128xf32>
    %cst_5 = arith.constant 2.500000e-01 : f32
    %15 = vector.broadcast %cst_5 : f32 to vector<6x8x128xf32>
    %16 = arith.mulf %15, %12 : vector<6x8x128xf32>
    %cst_6 = arith.constant 7.500000e-01 : f32
    %17 = vector.broadcast %cst_6 : f32 to vector<6x8x128xf32>
    %18 = arith.mulf %17, %13 : vector<6x8x128xf32>
    %19 = arith.addf %16, %18 : vector<6x8x128xf32>
    %cst_7 = arith.constant 7.500000e-01 : f32
    %20 = vector.broadcast %cst_7 : f32 to vector<6x8x128xf32>
    %21 = arith.mulf %20, %13 : vector<6x8x128xf32>
    %cst_8 = arith.constant 2.500000e-01 : f32
    %22 = vector.broadcast %cst_8 : f32 to vector<6x8x128xf32>
    %23 = arith.mulf %22, %14 : vector<6x8x128xf32>
    %24 = arith.addf %21, %23 : vector<6x8x128xf32>
    %25 = vector.extract_strided_slice %19 {offsets = [0, 0, 0], sizes = [4, 8, 128], strides = [1, 1, 1]} : vector<6x8x128xf32> to vector<4x8x128xf32>
    %cst_9 = arith.constant 2.500000e-01 : f32
    %26 = vector.broadcast %cst_9 : f32 to vector<4x8x128xf32>
    %27 = arith.mulf %26, %25 : vector<4x8x128xf32>
    %28 = vector.extract_strided_slice %19 {offsets = [1, 0, 0], sizes = [4, 8, 128], strides = [1, 1, 1]} : vector<6x8x128xf32> to vector<4x8x128xf32>
    %cst_10 = arith.constant 7.500000e-01 : f32
    %29 = vector.broadcast %cst_10 : f32 to vector<4x8x128xf32>
    %30 = arith.mulf %29, %28 : vector<4x8x128xf32>
    %31 = arith.addf %27, %30 : vector<4x8x128xf32>
    %c0_11 = arith.constant 0 : index
    %c0_12 = arith.constant 0 : index
    %c0_13 = arith.constant 0 : index
    %c0_14 = arith.constant 0 : index
    %c0_15 = arith.constant 0 : index
    %32 = vector.load %arg5[%c0_11, %c0_12, %c0_13, %c0_14, %c0_15] : memref<1x4x4x8x128xf32, #tpu.memory_space<vmem>>, vector<1x1x4x8x128xf32>
    %33 = vector.shape_cast %32 : vector<1x1x4x8x128xf32> to vector<4x8x128xf32>
    %34 = vector.shape_cast %31 : vector<4x8x128xf32> to vector<1x1x4x8x128xf32>
    tpu.vector_store %arg5[%c0_11, %c0_12, %c0_13, %c0_14, %c0_15], %34 {strides = array<i32>} : memref<1x4x4x8x128xf32, #tpu.memory_space<vmem>>, vector<1x1x4x8x128xf32>,
    %35 = vector.extract_strided_slice %24 {offsets = [0, 0, 0], sizes = [4, 8, 128], strides = [1, 1, 1]} : vector<6x8x128xf32> to vector<4x8x128xf32>
    %cst_16 = arith.constant 2.500000e-01 : f32
    %36 = vector.broadcast %cst_16 : f32 to vector<4x8x128xf32>
    %37 = arith.mulf %36, %35 : vector<4x8x128xf32>
    %38 = vector.extract_strided_slice %24 {offsets = [1, 0, 0], sizes = [4, 8, 128], strides = [1, 1, 1]} : vector<6x8x128xf32> to vector<4x8x128xf32>
    %cst_17 = arith.constant 7.500000e-01 : f32
    %39 = vector.broadcast %cst_17 : f32 to vector<4x8x128xf32>
    %40 = arith.mulf %39, %38 : vector<4x8x128xf32>
    %41 = arith.addf %37, %40 : vector<4x8x128xf32>
    %c0_18 = arith.constant 0 : index
    %c1 = arith.constant 1 : index
    %c0_19 = arith.constant 0 : index
    %c0_20 = arith.constant 0 : index
    %c0_21 = arith.constant 0 : index
    %42 = vector.load %arg5[%c0_18, %c1, %c0_19, %c0_20, %c0_21] : memref<1x4x4x8x128xf32, #tpu.memory_space<vmem>>, vector<1x1x4x8x128xf32>
    %43 = vector.shape_cast %42 : vector<1x1x4x8x128xf32> to vector<4x8x128xf32>
    %44 = vector.shape_cast %41 : vector<4x8x128xf32> to vector<1x1x4x8x128xf32>
    tpu.vector_store %arg5[%c0_18, %c1, %c0_19, %c0_20, %c0_21], %44 {strides = array<i32>} : memref<1x4x4x8x128xf32, #tpu.memory_space<vmem>>, vector<1x1x4x8x128xf32>,
    %45 = vector.extract_strided_slice %19 {offsets = [1, 0, 0], sizes = [4, 8, 128], strides = [1, 1, 1]} : vector<6x8x128xf32> to vector<4x8x128xf32>
    %cst_22 = arith.constant 7.500000e-01 : f32
    %46 = vector.broadcast %cst_22 : f32 to vector<4x8x128xf32>
    %47 = arith.mulf %46, %45 : vector<4x8x128xf32>
    %48 = vector.extract_strided_slice %19 {offsets = [2, 0, 0], sizes = [4, 8, 128], strides = [1, 1, 1]} : vector<6x8x128xf32> to vector<4x8x128xf32>
    %cst_23 = arith.constant 2.500000e-01 : f32
    %49 = vector.broadcast %cst_23 : f32 to vector<4x8x128xf32>
    %50 = arith.mulf %49, %48 : vector<4x8x128xf32>
    %51 = arith.addf %47, %50 : vector<4x8x128xf32>
    %c0_24 = arith.constant 0 : index
    %c2 = arith.constant 2 : index
    %c0_25 = arith.constant 0 : index
    %c0_26 = arith.constant 0 : index
    %c0_27 = arith.constant 0 : index
    %52 = vector.load %arg5[%c0_24, %c2, %c0_25, %c0_26, %c0_27] : memref<1x4x4x8x128xf32, #tpu.memory_space<vmem>>, vector<1x1x4x8x128xf32>
    %53 = vector.shape_cast %52 : vector<1x1x4x8x128xf32> to vector<4x8x128xf32>
    %54 = vector.shape_cast %51 : vector<4x8x128xf32> to vector<1x1x4x8x128xf32>
    tpu.vector_store %arg5[%c0_24, %c2, %c0_25, %c0_26, %c0_27], %54 {strides = array<i32>} : memref<1x4x4x8x128xf32, #tpu.memory_space<vmem>>, vector<1x1x4x8x128xf32>,
    %55 = vector.extract_strided_slice %24 {offsets = [1, 0, 0], sizes = [4, 8, 128], strides = [1, 1, 1]} : vector<6x8x128xf32> to vector<4x8x128xf32>
    %cst_28 = arith.constant 7.500000e-01 : f32
    %56 = vector.broadcast %cst_28 : f32 to vector<4x8x128xf32>
    %57 = arith.mulf %56, %55 : vector<4x8x128xf32>
    %58 = vector.extract_strided_slice %24 {offsets = [2, 0, 0], sizes = [4, 8, 128], strides = [1, 1, 1]} : vector<6x8x128xf32> to vector<4x8x128xf32>
    %cst_29 = arith.constant 2.500000e-01 : f32
    %59 = vector.broadcast %cst_29 : f32 to vector<4x8x128xf32>
    %60 = arith.mulf %59, %58 : vector<4x8x128xf32>
    %61 = arith.addf %57, %60 : vector<4x8x128xf32>
    %c0_30 = arith.constant 0 : index
    %c3 = arith.constant 3 : index
    %c0_31 = arith.constant 0 : index
    %c0_32 = arith.constant 0 : index
    %c0_33 = arith.constant 0 : index
    %62 = vector.load %arg5[%c0_30, %c3, %c0_31, %c0_32, %c0_33] : memref<1x4x4x8x128xf32, #tpu.memory_space<vmem>>, vector<1x1x4x8x128xf32>
    %63 = vector.shape_cast %62 : vector<1x1x4x8x128xf32> to vector<4x8x128xf32>
    %64 = vector.shape_cast %61 : vector<4x8x128xf32> to vector<1x1x4x8x128xf32>
    tpu.vector_store %arg5[%c0_30, %c3, %c0_31, %c0_32, %c0_33], %64 {strides = array<i32>} : memref<1x4x4x8x128xf32, #tpu.memory_space<vmem>>, vector<1x1x4x8x128xf32>,
    return
  }
  func.func @transform_0(%arg0: i32, %arg1: i32) -> (i32, i32, i32) {
    %c0_i32 = arith.constant 0 : i32
    %c0_i32_0 = arith.constant 0 : i32
    %c0_i32_1 = arith.constant 0 : i32
    return %arg0, %c0_i32, %c0_i32_0 : i32, i32, i32
  }
  func.func @transform_1(%arg0: i32, %arg1: i32) -> (i32, i32) {
    %c0_i32 = arith.constant 0 : i32
    %c0_i32_0 = arith.constant 0 : i32
    %c0_i32_1 = arith.constant 0 : i32
    return %c0_i32, %c0_i32_0 : i32, i32
  }
  func.func @transform_2(%arg0: i32, %arg1: i32) -> (i32, i32) {
    %c0_i32 = arith.constant 0 : i32
    %c0_i32_0 = arith.constant 0 : i32
    %c0_i32_1 = arith.constant 0 : i32
    return %c0_i32, %c0_i32_0 : i32, i32
  }
  func.func @transform_3(%arg0: i32, %arg1: i32) -> (i32, i32, i32, i32, i32) {
    %c0_i32 = arith.constant 0 : i32
    %c0_i32_0 = arith.constant 0 : i32
    %c0_i32_1 = arith.constant 0 : i32
    %c0_i32_2 = arith.constant 0 : i32
    return %arg0, %c0_i32, %arg1, %c0_i32_0, %c0_i32_1 : i32, i32, i32, i32, i32
  }
}

</mosaic_0001>

<bundles_post_ra>
// kernel: reassemble_project_upsample.1
= control target key start
LH: loop header
LB: loop body
LE: loop exit
PB: predicated region body
PF: predicated region fallthrough
CT: control target
= control target key end

     0   :  { %s977_s12 = smov 0   ;;  %s979_s13 = smov 0   ;;  %s1198_s0 = inlined_call_operand.vmem [shape: bf16[2,160,128], index: 0, kind: input, shape index: {}]   ;;  %s1199_s1 = inlined_call_operand.vmem [shape: bf16[128,128], index: 1, kind: input, shape index: {}]   ;;  %s1200_s2 = inlined_call_operand.vmem [shape: f32[1,128], index: 2, kind: input, shape index: {}]   ;;  %s1201_s3 = inlined_call_operand.vmem [shape: f32[2,4,8,8,128], index: 3, kind: output, shape index: {}]  }
   0x1   :  { %s981_s14 = smov 0   ;;  %s983_s15 = smov 0  }
   0x2   :  { %s985_s16 = smov 0   ;;  %s987_s17 = smov 0  }
   0x3   :  { %s989_s18 = smov 0  }
   0x4 LB: > { %s22_s19 = sadd.s32 1, %s947_s16  ;;  %s25_s20 = sadd.s32 1, %s951_s17  ;;  %s955_s18 = sphi %s989_s18, %s13_s18   ;;  %s951_s17 = sphi %s987_s17, %s1208_s17   ;;  %s947_s16 = sphi %s985_s16, %s1207_s16   ;;  %s943_s15 = sphi %s983_s15, %s1206_s15   ;;  %s939_s14 = sphi %s981_s14, %s1205_s14   ;;  %s935_s13 = sphi %s979_s13, %s1204_s13   ;;  %s931_s12 = sphi %s977_s12, %s1203_s12  }
   0x5   : > { %p23_p0 = scmp.ge.s32.totalorder %s22_s19, 2  ;;  %s714_s21 = sadd.s32 4294967295, %s955_s18  }
   0x6   : > { %p112_p1 = scmp.ne.s32.totalorder %s935_s13, %s931_s12  ;;  %p113_p2 = scmp.eq.s32.totalorder %s714_s21, 3 }
   0x7   : > { %s1210_s19 = smov (%p23_p0, %s22_s19), 0  ;;  %s1212_s20 = smov (!%p23_p0, %s25_s20), %s951_s17 }
   0x8   : > { %s98_s22 = ssub.s32 %s947_s16, %s1210_s19  ;;  %p27_p3 = scmp.ge.s32.totalorder %s1212_s20, 2 }
   0x9   : > { %p718_p4 = scmp.ge.s32.totalorder %s955_s18, 1  ;;  %p1023_p5 = por %p113_p2, %p112_p1 }
   0xa   : > { %p151_p6 = scmp.lt.s32.totalorder %s955_s18, 5  ;;  %s1214_s20 = smov (%p27_p3, %s1212_s20), 0 }
   0xb   : > { %s97_s24 = ssub.s32 %s951_s17, %s1214_s20  ;;  %s102_s26 = sadd.s32 1, %s935_s13 }
   0xc   : > { %p152_p7 = pnand %p718_p4, %p151_p6  ;;  %s99_s25 = sor.u32 %s98_s22, %s97_s24 }
   0xd   : > { %p100_p8 = scmp.eq.s32.totalorder %s99_s25, 0  ;;  %p174_p9 = scmp.lt.s32.totalorder (!%p152_p7), %s943_s15, 1 }
   0xe   : > { %155 = sbr.rel (%p152_p7) target bundleno = 245 (0xf5), region = 32  ;;  %s721_s21 = sshll.u32 (!%p152_p7), %s939_s14, 6 }
   0xf   : > { %s1034_s27 = scalar_select %p100_p8, %s935_s13, %s102_s26  }
  0x10   : > { %s181_s26 = sshra.s32 (!%p152_p7), %s721_s21, 3  ;;  %s171_s21 = sand.u32 (!%p152_p7), 1, %s931_s12  }
  0x11   : > { %s722_s6 = sshll.u32 (!%p152_p7), %s181_s26, 2  ;;  %s719_s22 = sshll.u32 (!%p152_p7), %s171_s21, 7 }
  0x12   : > { %s1107_s12 = scalar_lea.vmem (!%p152_p7), [#allocation2], %s719_s22 }
  0x13   : > { %v818_v0 = vld [vmem:[%s1199_s1 + $0x38] sm:$0xff]  ;;  %v817_v1 = vld [vmem:[%s1199_s1 + $0x30] sm:$0xff]  ;;  %v816_v2 = vld [vmem:[%s1199_s1 + $0x28] sm:$0xff]  ;;  %s175_s11 = scalar_select %p174_p9, %s943_s15, 1  ;;  %vm370_vm0 = vcmask 1046528  }
  0x14   : > { %820 = vmatpush.bf16.msra.mxu2 %v818_v0  ;;  %821 = vmatpush.bf16.msra.mxu3 %v818_v0  ;;  %v815_v3 = vld [vmem:[%s1199_s1 + $0x20] sm:$0xff]  ;;  %v814_v4 = vld [vmem:[%s1199_s1 + $0x18] sm:$0xff]  ;;  %v813_v5 = vld [vmem:[%s1199_s1 + $0x10] sm:$0xff]  ;;  %s800_s24 = sshll.u32 (%p1023_p5), %s939_s14, 2 }
  0x15   : > { %819 = vmatpush.bf16.msra.mxu1 %v818_v0  ;;  %301 = vmatpush.bf16.msra.mxu0 %v818_v0  ;;  %s843_s25 = smul.u32 80, %s175_s11  ;;  %v812_v6 = vld [vmem:[%s1199_s1 + $0x8] sm:$0xff]  ;;  %v811_v7 = vld [vmem:[%s1199_s1] sm:$0xff] }
  0x16   : > { %v1069_v14 = vld [vmem:[%s1200_s2] ss:$0 sm:$0xff] }
  0x17   : > { %s178_s5 = scalar_lea.vmem %s1198_s0, %s843_s25  ;;  %s801_s25 = sshll.u32 (%p1023_p5), %s943_s15, 5 }
  0x18   : > { %823 = vmatpush.bf16.msra.mxu2 %v817_v1  ;;  %824 = vmatpush.bf16.msra.mxu3 %v817_v1  ;;  %s184_s9 = scalar_lea.vmem %s178_s5, %s722_s6  ;;  %s551_s26 = sadd.s32 (%p1023_p5), %s801_s25, %s800_s24 }
  0x19   : > { %822 = vmatpush.bf16.msra.mxu1 %v817_v1  ;;  %302 = vmatpush.bf16.msra.mxu0 %v817_v1  ;;  %v807_v8 = vld [vmem:[%s184_s9 + $0x10] sm:$0xff]  ;;  %v809_v9 = vld [vmem:[%s184_s9 + $0x20] sm:$0xff]  ;;  %v806_v10 = vld [vmem:[%s184_s9 + $0x8] sm:$0xff]  ;;  %s802_s28 = sshll.u32 (%p1023_p5), %s551_s26, 3 }
  0x1a   : > { %v805_v11 = vld [vmem:[%s184_s9] sm:$0xff]  ;;  %v808_v12 = vld [vmem:[%s184_s9 + $0x18] sm:$0xff]  ;;  %v810_v13 = vld [vmem:[%s184_s9 + $0x28] sm:$0xff]  ;;  %s553_s30 = scalar_lea.vmem (%p1023_p5), %s1201_s3, %s802_s28 }
  0x1c   : > { %826 = vmatpush.bf16.msra.mxu2 %v816_v2  ;;  %827 = vmatpush.bf16.msra.mxu3 %v816_v2 }
  0x1d   : > { %825 = vmatpush.bf16.msra.mxu1 %v816_v2  ;;  %303 = vmatpush.bf16.msra.mxu0 %v816_v2 }
  0x20   : > { %829 = vmatpush.bf16.msra.mxu2 %v815_v3  ;;  %830 = vmatpush.bf16.msra.mxu3 %v815_v3 }
  0x21   : > { %828 = vmatpush.bf16.msra.mxu1 %v815_v3  ;;  %304 = vmatpush.bf16.msra.mxu0 %v815_v3 }
  0x24   : > { %832 = vmatpush.bf16.msra.mxu2 %v814_v4  ;;  %833 = vmatpush.bf16.msra.mxu3 %v814_v4 }
  0x25   : > { %831 = vmatpush.bf16.msra.mxu1 %v814_v4  ;;  %305 = vmatpush.bf16.msra.mxu0 %v814_v4 }
  0x28   : > { %835 = vmatpush.bf16.msra.mxu2 %v813_v5  ;;  %836 = vmatpush.bf16.msra.mxu3 %v813_v5 }
  0x29   : > { %834 = vmatpush.bf16.msra.mxu1 %v813_v5  ;;  %306 = vmatpush.bf16.msra.mxu0 %v813_v5 }
  0x2c   : > { %838 = vmatpush.bf16.msra.mxu2 %v812_v6  ;;  %839 = vmatpush.bf16.msra.mxu3 %v812_v6 }
  0x2d   : > { %837 = vmatpush.bf16.msra.mxu1 %v812_v6  ;;  %307 = vmatpush.bf16.msra.mxu0 %v812_v6 }
  0x30   : > { %841 = vmatpush.bf16.msra.mxu2 %v811_v7  ;;  %842 = vmatpush.bf16.msra.mxu3 %v811_v7 }
  0x31   : > { %840 = vmatpush.bf16.msra.mxu1 %v811_v7  ;;  %308 = vmatpush.bf16.msra.mxu0 %v811_v7 }
  0x33   : > { %319 = vmatmul.bf16.vlgmr.msra.gmra.mxu2 %v807_v8  ;;  %329 = vmatmul.bf16.vlgmr.msra.gmra.mxu3 %v809_v9 }
  0x34   : > { %314 = vmatmul.bf16.vlgmr.msra.gmra.mxu1 %v806_v10  ;;  %309 = vmatmul.bf16.vlgmr.msra.gmra.mxu0 %v805_v11 }
  0x43   : > { %324 = vmatmul.bf16.gmra.mxu2 %v808_v12  ;;  %334 = vmatmul.bf16.gmra.mxu3 %v810_v13 }
  0xb1   : > { %v315_v15 = vpop.f32.mrf.mxu1  ;;  %v310_v16 = vpop.f32.mrf.mxu0 }
  0xb2   : > { %v316_v17 = vadd.f32 %v1069_v14, %v315_v15  ;;  %v311_v20 = vadd.f32 %v1069_v14, %v310_v16 }
  0xb4   : > { %v348_v21 = vmul.f32 0.75, %v316_v17  ;;  %v341_v22 = vmul.f32 0.25, %v316_v17  ;;  %v1073_v25 = vmul.f32 0.75, %v311_v20  ;;  %v340_v34 = vmul.f32 0.25, %v311_v20 }
  0xb6   : > { %v320_v18 = vpop.f32.mrf.mxu2  ;;  %v330_v19 = vpop.f32.mrf.mxu3  ;;  %v374_v28 = vrot.slane %v348_v21, 1  ;;  %v422_v30 = vrot.slane %v341_v22, 1  ;;  %v371_v35 = vrot.slane %v1073_v25, 1  ;;  %v419_v52 = vrot.slane %v340_v34, 1 }
  0xb7   : > { %v321_v29 = vadd.f32 %v1069_v14, %v320_v18  ;;  %v331_v55 = vadd.f32 %v1069_v14, %v330_v19 }
  0xb9   : > { %v317_v23 = vpop.f32.mrf.mxu1  ;;  %v312_v24 = vpop.f32.mrf.mxu0  ;;  %v342_v40 = vmul.f32 0.25, %v321_v29  ;;  %v350_v41 = vmul.f32 0.75, %v321_v29  ;;  %v344_v20 = vmul.f32 0.25, %v331_v55 }
  0xba   : > { %v318_v26 = vadd.f32 %v1069_v14, %v317_v23  ;;  %v313_v27 = vadd.f32 %v1069_v14, %v312_v24 }
  0xbb   : > { %v377_v53 = vrot.slane %v350_v41, 1  ;;  %v425_v54 = vrot.slane %v342_v40, 1 }
  0xbc   : > { %v349_v31 = vmul.f32 0.75, %v318_v26  ;;  %v402_v32 = vmul.f32 0.25, %v318_v26  ;;  %v347_v33 = vmul.f32 0.75, %v313_v27  ;;  %v401_v43 = vmul.f32 0.25, %v313_v27 }
  0xbe   : > { %v375_v36 = vrot.slane %v349_v31, 1  ;;  %v423_v37 = vrot.slane %v402_v32, 1  ;;  %v322_v38 = vpop.f32.mrf.mxu2  ;;  %v332_v39 = vpop.f32.mrf.mxu3  ;;  %v372_v47 = vrot.slane %v347_v33, 1  ;;  %v420_v60 = vrot.slane %v401_v43, 1 }
  0xbf   : > { %v323_v42 = vadd.f32 %v1069_v14, %v322_v38  ;;  %v333_v46 = vadd.f32 %v1069_v14, %v332_v39  ;;  %v431_v39 = vrot.slane %v344_v20, 1 }
  0xc0   : > { %v376_v44 = vsel %vm370_vm0, %v374_v28, %v375_v36  ;;  %v424_v45 = vsel %vm370_vm0, %v422_v30, %v423_v37  ;;  %v452_v49 = vadd.f32 %v423_v37, %v349_v31  ;;  %v373_v59 = vsel %vm370_vm0, %v371_v35, %v372_v47 }
  0xc1   : > { %v396_v48 = vadd.f32 %v376_v44, %v341_v22  ;;  %v351_v50 = vmul.f32 0.75, %v323_v42  ;;  %v403_v51 = vmul.f32 0.25, %v323_v42  ;;  %v451_v56 = vadd.f32 %v424_v45, %v348_v21 }
  0xc2   : > { %v480_v62 = vmul.f32 0.25, %v452_v49  ;;  %v486_v63 = vmul.f32 0.75, %v452_v49  ;;  %v1086_v0 = vmul.f32 0.75, %v333_v46  ;;  %v395_v13 = vadd.f32 %v373_v59, %v340_v34 }
  0xc3   : > { %v378_v57 = vrot.slane %v351_v50, 1  ;;  %v426_v58 = vrot.slane %v403_v51, 1  ;;  %v462_v61 = vmul.f32 0.25, %v396_v48  ;;  %v465_v1 = vmul.f32 0.75, %v396_v48 }
  0xc4   : > { %v479_v7 = vmul.f32 0.25, %v451_v56  ;;  %v485_v8 = vmul.f32 0.75, %v451_v56  ;;  %v450_v15 = vadd.f32 %v420_v60, %v347_v33  ;;  %v354_v21 = vmul.f32 0.75, %v331_v55 }
  0xc5   : > { %v379_v2 = vsel %vm370_vm0, %v377_v53, %v378_v57  ;;  %v427_v3 = vsel %vm370_vm0, %v425_v54, %v426_v58  ;;  %v454_v4 = vadd.f32 %v426_v58, %v351_v50  ;;  %v421_v23 = vsel %vm370_vm0, %v419_v52, %v420_v60 }
  0xc6   : > { %v325_v5 = vpop.f32.mrf.mxu2  ;;  %v335_v6 = vpop.f32.mrf.mxu3  ;;  %v397_v9 = vadd.f32 %v379_v2, %v342_v40  ;;  %v453_v10 = vadd.f32 %v427_v3, %v350_v41  ;;  %v405_v28 = vmul.f32 0.25, %v333_v46  ;;  %v384_v31 = vrot.slane %v1086_v0, 1 }
  0xc7   : > { %v1090_v11 = vmul.f32 0.25, %v454_v4  ;;  %v1092_v12 = vmul.f32 0.75, %v454_v4  ;;  %v449_v32 = vadd.f32 %v421_v23, %v1073_v25  ;;  %v461_v33 = vmul.f32 0.25, %v395_v13 }
  0xc8   : > { %v1094_v16 = vmul.f32 0.25, %v397_v9  ;;  %v1096_v17 = vmul.f32 0.75, %v397_v9  ;;  %v1098_v18 = vmul.f32 0.25, %v453_v10  ;;  %v1100_v19 = vmul.f32 0.75, %v453_v10 }
  0xc9   : > { %v496_v22 = vadd.f32 %v1092_v12, %v480_v62  ;;  %v526_v30 = vadd.f32 %v486_v63, %v1090_v11  ;;  %v478_v34 = vmul.f32 0.25, %v450_v15  ;;  %v326_v35 = vadd.f32 %v1069_v14, %v325_v5 }
  0xca   : > { %v470_v24 = vadd.f32 %v1096_v17, %v462_v61  ;;  %v495_v26 = vadd.f32 %v1100_v19, %v479_v7  ;;  %v512_v27 = vadd.f32 %v465_v1, %v1094_v16  ;;  %v525_v29 = vadd.f32 %v485_v8, %v1098_v18 }
  0xcb   : > { %782 = vst [vmem:[%s1107_s12 + $0x2f] sm:$0x1] %v496_v22  ;;  %v383_v36 = vrot.slane %v354_v21, 1  ;;  %v432_v40 = vrot.slane %v405_v28, 1  ;;  %v469_v41 = vadd.f32 %v465_v1, %v461_v33  ;;  %v477_v42 = vmul.f32 0.25, %v449_v32 }
  0xcc   : > { %474 = vst [vmem:[%s1107_s12 + $0x8] sm:$0xff] %v470_v24  ;;  %v494_v43 = vadd.f32 %v486_v63, %v478_v34  ;;  %v352_v44 = vmul.f32 0.75, %v326_v35  ;;  %v336_v25 = vadd.f32 %v1069_v14, %v335_v6  ;;  %v343_v48 = vmul.f32 0.25, %v326_v35 }
  0xcd   : > { %781 = vst [vmem:[%s1107_s12 + $0x27] sm:$0xfe] %v495_v26  ;;  %v385_v46 = vsel %vm370_vm0, %v383_v36, %v384_v31  ;;  %v493_v47 = vadd.f32 %v485_v8, %v477_v42  ;;  %v433_v51 = vsel %vm370_vm0, %v431_v39, %v432_v40  ;;  %v458_v5 = vadd.f32 %v432_v40, %v1086_v0 }
  0xce   : > { %v327_v37 = vpop.f32.mrf.mxu2  ;;  %v337_v38 = vpop.f32.mrf.mxu3  ;;  %787 = vst [vmem:[%s1107_s12 + $0x40] sm:$0xff] %v512_v27  ;;  %v399_v55 = vadd.f32 %v385_v46, %v344_v20  ;;  %v380_v56 = vrot.slane %v352_v44, 1  ;;  %v356_v57 = vmul.f32 0.75, %v336_v25  ;;  %v428_v59 = vrot.slane %v343_v48, 1 }
  0xcf   : > { %791 = vst [vmem:[%s1107_s12 + $0x5f] sm:$0xfe] %v525_v29  ;;  %v328_v45 = vadd.f32 %v1069_v14, %v327_v37  ;;  %v338_v49 = vadd.f32 %v1069_v14, %v337_v38  ;;  %v345_v60 = vmul.f32 0.25, %v336_v25  ;;  %v457_v62 = vadd.f32 %v433_v51, %v354_v21 }
  0xd0   : > { %792 = vst [vmem:[%s1107_s12 + $0x67] sm:$0x1] %v526_v30  ;;  %v468_v6 = vmul.f32 0.75, %v399_v55  ;;  %v386_v7 = vrot.slane %v356_v57, 1  ;;  %v492_v28 = vmul.f32 0.75, %v458_v5  ;;  %v510_v33 = vmul.f32 0.25, %v399_v55 }
  0xd1   : > { %473 = vst [vmem:[%s1107_s12] sm:$0xff] %v469_v41  ;;  %v353_v50 = vmul.f32 0.75, %v328_v45  ;;  %v404_v52 = vmul.f32 0.25, %v328_v45  ;;  %v357_v53 = vmul.f32 0.75, %v338_v49  ;;  %v406_v54 = vmul.f32 0.25, %v338_v49 }
  0xd2   : > { %779 = vst [vmem:[%s1107_s12 + $0x1f] sm:$0xfe] %v493_v47  ;;  %v434_v9 = vrot.slane %v345_v60, 1  ;;  %v491_v24 = vmul.f32 0.75, %v457_v62  ;;  %v522_v39 = vmul.f32 0.25, %v458_v5 }
  0xd3   : > { %780 = vst [vmem:[%s1107_s12 + $0x27] sm:$0x1] %v494_v43  ;;  %v381_v58 = vrot.slane %v353_v50, 1  ;;  %v429_v61 = vrot.slane %v404_v52, 1  ;;  %v387_v14 = vrot.slane %v357_v53, 1  ;;  %v435_v4 = vrot.slane %v406_v54, 1 }
  0xd4   : > { %v614_v45 = vld [vmem:[%s1107_s12 + $0x8] sm:$0xff] (%p1023_p5) }
  0xd5   : > { %v382_v63 = vsel %vm370_vm0, %v380_v56, %v381_v58  ;;  %v430_v2 = vsel %vm370_vm0, %v428_v59, %v429_v61  ;;  %v456_v3 = vadd.f32 %v429_v61, %v353_v50  ;;  %v388_v23 = vsel %vm370_vm0, %v386_v7, %v387_v14  ;;  %615 = vst [vmem:[%s553_s30 + $0x8] sm:$0xff] (%p1023_p5), %v614_v45  ;;  %v622_v49 = vld [vmem:[%s1107_s12 + $0x28] sm:$0xff] (%p1023_p5)  ;;  %v628_v52 = vld [vmem:[%s1107_s12 + $0x40] sm:$0xff] (%p1023_p5) }
  0xd6   : > { %v398_v1 = vadd.f32 %v382_v63, %v343_v48  ;;  %v455_v8 = vadd.f32 %v430_v2, %v352_v44  ;;  %v436_v27 = vsel %vm370_vm0, %v434_v9, %v435_v4  ;;  %v400_v32 = vadd.f32 %v388_v23, %v345_v60  ;;  %623 = vst [vmem:[%s553_s30 + $0x48] sm:$0xff] (%p1023_p5), %v622_v49 }
  0xd7   : > { %v490_v15 = vmul.f32 0.75, %v456_v3  ;;  %v484_v21 = vmul.f32 0.25, %v456_v3  ;;  %v459_v35 = vadd.f32 %v436_v27, %v356_v57  ;;  %v460_v36 = vadd.f32 %v435_v4, %v357_v53  ;;  %629 = vst [vmem:[%s553_s30 + $0x80] sm:$0xff] (%p1023_p5), %v628_v52  ;;  %v636_v56 = vld [vmem:[%s1107_s12 + $0x60] sm:$0xff] (%p1023_p5) }
  0xd8   : > { %v464_v10 = vmul.f32 0.25, %v398_v1  ;;  %v467_v13 = vmul.f32 0.75, %v398_v1  ;;  %v483_v20 = vmul.f32 0.25, %v455_v8  ;;  %v489_v22 = vmul.f32 0.75, %v455_v8  ;;  %637 = vst [vmem:[%s553_s30 + $0xc0] sm:$0xff] (%p1023_p5), %v636_v56 }
  0xd9   : > { %v498_v30 = vadd.f32 %v490_v15, %v1090_v11  ;;  %v500_v34 = vadd.f32 %v492_v28, %v484_v21  ;;  %v511_v38 = vmul.f32 0.25, %v400_v32  ;;  %v528_v40 = vadd.f32 %v1092_v12, %v484_v21  ;;  %v612_v12 = vld [vmem:[%s1107_s12] sm:$0xff] (%p1023_p5) }
  0xda   : > { %v471_v26 = vadd.f32 %v467_v13, %v1094_v16  ;;  %v472_v0 = vadd.f32 %v468_v6, %v464_v10  ;;  %v497_v29 = vadd.f32 %v489_v22, %v1098_v18  ;;  %v499_v31 = vadd.f32 %v491_v24, %v483_v20  ;;  %613 = vst [vmem:[%s553_s30] sm:$0xff] (%p1023_p5), %v612_v12  ;;  %v620_v48 = vld [vmem:[%s1107_s12 + $0x20] sm:$0xff] (%p1023_p5) }
  0xdb   : > { %v513_v16 = vadd.f32 %v1096_v17, %v464_v10  ;;  %784 = vst [vmem:[%s1107_s12 + $0x37] sm:$0x1] %v498_v30  ;;  %v514_v37 = vadd.f32 %v510_v33, %v467_v13  ;;  %v521_v18 = vmul.f32 0.25, %v457_v62  ;;  %v527_v11 = vadd.f32 %v1100_v19, %v483_v20 }
  0xdc   : > { %475 = vst [vmem:[%s1107_s12 + $0x10] sm:$0xff] %v471_v26  ;;  %v523_v17 = vmul.f32 0.25, %v459_v35  ;;  %v524_v42 = vmul.f32 0.25, %v460_v36  ;;  %v530_v43 = vadd.f32 %v522_v39, %v490_v15  ;;  %v515_v44 = vadd.f32 %v511_v38, %v468_v6 }
  0xdd   : > { %476 = vst [vmem:[%s1107_s12 + $0x18] sm:$0xff] %v472_v0  ;;  %v529_v41 = vadd.f32 %v521_v18, %v489_v22 }
  0xde   : > { %783 = vst [vmem:[%s1107_s12 + $0x2f] sm:$0xfe] %v497_v29  ;;  %v531_v25 = vadd.f32 %v523_v17, %v491_v24  ;;  %v532_v19 = vadd.f32 %v524_v42, %v492_v28 }
  0xdf   : > { %785 = vst [vmem:[%s1107_s12 + $0x37] sm:$0xfe] %v499_v31 }
  0xe0   : > { %786 = vst [vmem:[%s1107_s12 + $0x3f] sm:$0x1] %v500_v34 }
  0xe1   : > { %788 = vst [vmem:[%s1107_s12 + $0x48] sm:$0xff] %v513_v16 }
  0xe2   : > { %789 = vst [vmem:[%s1107_s12 + $0x50] sm:$0xff] %v514_v37 }
  0xe3   : > { %793 = vst [vmem:[%s1107_s12 + $0x67] sm:$0xfe] %v527_v11  ;;  %v616_v46 = vld [vmem:[%s1107_s12 + $0x10] sm:$0xff] (%p1023_p5) }
  0xe4   : > { %794 = vst [vmem:[%s1107_s12 + $0x6f] sm:$0x1] %v528_v40  ;;  %v618_v47 = vld [vmem:[%s1107_s12 + $0x18] sm:$0xff] (%p1023_p5) }
  0xe5   : > { %795 = vst [vmem:[%s1107_s12 + $0x6f] sm:$0xfe] %v529_v41  ;;  %548 = sbr.rel (!%p1023_p5) target bundleno = 245 (0xf5), region = 36  ;;  %v624_v50 = vld [vmem:[%s1107_s12 + $0x30] sm:$0xff] (%p1023_p5) }
  0xe6   : > { %796 = vst [vmem:[%s1107_s12 + $0x77] sm:$0x1] %v530_v43 }
  0xe7   : > { %790 = vst [vmem:[%s1107_s12 + $0x58] sm:$0xff] %v515_v44  ;;  %v626_v51 = vld [vmem:[%s1107_s12 + $0x38] sm:$0xff] (%p1023_p5) }
  0xe8   : > { %797 = vst [vmem:[%s1107_s12 + $0x77] sm:$0xfe] %v531_v25  ;;  %v630_v53 = vld [vmem:[%s1107_s12 + $0x48] sm:$0xff] (%p1023_p5) }
  0xe9   : > { %798 = vst [vmem:[%s1107_s12 + $0x7f] sm:$0x1] %v532_v19  ;;  %v632_v54 = vld [vmem:[%s1107_s12 + $0x50] sm:$0xff] (%p1023_p5) }
  0xea   : > { %617 = vst [vmem:[%s553_s30 + $0x10] sm:$0xff] %v616_v46 }
  0xeb   : > { %619 = vst [vmem:[%s553_s30 + $0x18] sm:$0xff] %v618_v47  ;;  %v638_v57 = vld [vmem:[%s1107_s12 + $0x68] sm:$0xff] }
  0xec   : > { %621 = vst [vmem:[%s553_s30 + $0x40] sm:$0xff] %v620_v48 }
  0xed   : > { %625 = vst [vmem:[%s553_s30 + $0x50] sm:$0xff] %v624_v50  ;;  %v640_v58 = vld [vmem:[%s1107_s12 + $0x70] sm:$0xff] }
  0xee   : > { %627 = vst [vmem:[%s553_s30 + $0x58] sm:$0xff] %v626_v51  ;;  %v634_v55 = vld [vmem:[%s1107_s12 + $0x58] sm:$0xff] }
  0xef   : > { %631 = vst [vmem:[%s553_s30 + $0x88] sm:$0xff] %v630_v53 }
  0xf0   : > { %633 = vst [vmem:[%s553_s30 + $0x90] sm:$0xff] %v632_v54  ;;  %v642_v59 = vld [vmem:[%s1107_s12 + $0x78] sm:$0xff] }
  0xf1   : > { %635 = vst [vmem:[%s553_s30 + $0x98] sm:$0xff] %v634_v55 }
  0xf2   : > { %639 = vst [vmem:[%s553_s30 + $0xc8] sm:$0xff] %v638_v57 }
  0xf3   : > { %641 = vst [vmem:[%s553_s30 + $0xd0] sm:$0xff] %v640_v58 }
  0xf4   : > { %643 = vst [vmem:[%s553_s30 + $0xd8] sm:$0xff] %v642_v59 }
  0xf5 PF: > { %s13_s18 = sadd.s32 1, %s955_s18   ;;  %s1203_s12 = smov %s935_s13 }
  0xf6   : > { %p10_p10 = scmp.ge.s32.totalorder %s13_s18, 6   ;;  %s1204_s13 = smov %s1034_s27 }
  0xf7   : > { %s1205_s14 = smov %s947_s16  ;;  %s1206_s15 = smov %s951_s17 }
  0xf8   : > { %s1207_s16 = smov %s1210_s19  ;;  %s1208_s17 = smov %s1214_s20 }
  0xf9   :  { %12 = sbr.rel (!%p10_p10) target bundleno = 4 (0x4), region = 104 }

</bundles_post_ra>
